<compile_context>
chip_gen: v6e
topology: v6e:2x2x1
jax: 0.10.0
libtpu: 0.0.40
codegen_flags: <defaults>
</compile_context>

<pallas_src>
import jax
import jax.numpy as jnp
from jax import lax
from jax.experimental import pallas as pl
from jax.experimental.pallas import tpu as pltpu

_LANE = 128
_SUBLANE = 8
_F32_MIN = float(jnp.finfo(jnp.float32).min)


def _cdiv(a, b):
    return -(-a // b)


def _round_up(x, m):
    return _cdiv(x, m) * m


def _sublane_pack(dtype):
    # minimum sublane granularity per dtype packing (f32:8, bf16:16, int8/fp8:32)
    return {4: 8, 2: 16, 1: 32}.get(jnp.dtype(dtype).itemsize, 8)


def _tpu_budgets():
    """(vmem_limit_bytes, io_block_target_bytes) derived from physical VMEM."""
    phys = None
    try:
        phys = int(pltpu.get_tpu_info().vmem_capacity_bytes)
    except Exception:
        try:
            kind = jax.devices()[0].device_kind.lower()
            phys = 64 * 2**20 if ("v7" in kind or "7x" in kind) else 128 * 2**20
        except Exception:
            phys = 64 * 2**20                      # conservative (v7x-safe)
    vmem_limit = min(int(phys * 0.65), 96 * 2**20)  # ~83 MiB on 128 MiB parts, ~41 MiB on v7x
    block_target = 6 * 2**20 if phys >= 128 * 2**20 else 4 * 2**20
    return vmem_limit, block_target


# ---------------------------------------------------------------------------
# Path A: whole row resident in VMEM, tiled over batch (no padding anywhere).
# ---------------------------------------------------------------------------
def _row_lse_kernel(x_ref, o_ref):
    x = x_ref[...].astype(jnp.float32)                      # (TB, N)
    m = jnp.max(x, axis=-1, keepdims=True)
    s = jnp.sum(jnp.exp(x - m), axis=-1, keepdims=True)
    lz = jnp.log(s) + m
    o_ref[...] = (x - lz).astype(o_ref.dtype)


def _heat_lse_rows(x2, out_dtype, vmem_limit, block_target, pack):
    b, n = x2.shape
    isz = jnp.dtype(x2.dtype).itemsize
    n_lanes = _round_up(n, _LANE)                 # physical lane footprint of one row
    per_row = n_lanes * (4 * isz + 16)            # dbl-buf in+out + f32/exp temporaries

    if b <= pack:
        tb = b                                    # full-dim batch block
    else:
        tb_vmem = max(pack, (vmem_limit // per_row) // pack * pack)
        tb_tgt = max(pack, (block_target // (n_lanes * isz)) // pack * pack)
        tb_cap = min(tb_vmem, tb_tgt)
        # Balance batch blocks (no oversized overhang) and keep >=4 grid steps
        # when the batch allows, so the "parallel" axis shards across v7x's TCs.
        g = max(_cdiv(b, tb_cap), min(4, b // pack))
        tb = max(pack, min(tb_cap, _round_up(_cdiv(b, g), pack)))

    return pl.pallas_call(
        _row_lse_kernel,
        out_shape=jax.ShapeDtypeStruct((b, n), out_dtype),
        grid=(_cdiv(b, tb),),
        in_specs=[pl.BlockSpec((tb, n), lambda i: (i, 0))],
        out_specs=pl.BlockSpec((tb, n), lambda i: (i, 0)),
        compiler_params=pltpu.CompilerParams(
            dimension_semantics=("parallel",),
            vmem_limit_bytes=vmem_limit),
        cost_estimate=pl.CostEstimate(
            flops=4 * b * n, transcendentals=b * n,
            bytes_accessed=2 * b * n * isz),
    )(x2)


# ---------------------------------------------------------------------------
# Path B: two-call online log-sum-exp for huge rows.
#   call 1: per-(batch, split) partial (max, rescaled exp-sum) stats
#   wrapper: tiny combine -> lz per row
#   call 2: elementwise write-out x - lz
# ---------------------------------------------------------------------------
def _heat_lse_online(x2, out_dtype, vmem_limit, block_target, pack):
    b, n = x2.shape
    isz = jnp.dtype(x2.dtype).itemsize

    # ---- stats phase input: needs a (b, R, 128) view; pad only if ragged ------
    if n % _LANE:
        # TODO(synk): mask the ragged tail in-kernel to avoid this one-off padded
        # copy (one extra HBM round trip; rare for the huge rows that hit Path B).
        fill = (float(jnp.finfo(x2.dtype).min)
                if jnp.issubdtype(x2.dtype, jnp.floating) else -(2 ** 30))
        xp = jnp.pad(x2, ((0, 0), (0, _LANE - n % _LANE)), constant_values=fill)
    else:
        xp = x2
    r_rows = xp.shape[1] // _LANE
    x3 = xp.reshape(b, r_rows, _LANE)

    tr = max(pack, (block_target // (_LANE * isz)) // pack * pack)
    tr = min(tr, _round_up(r_rows, pack))
    chunks = _cdiv(r_rows, tr)
    n_splits = min(8, chunks)          # row split = second "parallel" axis (B==1 still feeds 2 TCs)
    cpt = _cdiv(chunks, n_splits)
    needs_mask = (n_splits * cpt * tr != r_rows)

    def stats_kernel(x_ref, m_ref, l_ref):
        si = pl.program_id(1)
        ci = pl.program_id(2)

        @pl.when(ci == 0)
        def _init():
            m_ref[...] = jnp.full(m_ref.shape, _F32_MIN, jnp.float32)
            l_ref[...] = jnp.zeros(l_ref.shape, jnp.float32)

        x = x_ref[...].reshape(tr, _LANE).astype(jnp.float32)
        if needs_mask:
            # logical (unclamped) chunk position; rows past R (or duplicated
            # clamped chunks) are neutralized with a finite large-negative value.
            start = (si * cpt + ci) * tr
            rows = start + lax.broadcasted_iota(jnp.int32, (tr, _LANE), 0)
            x = jnp.where(rows < r_rows, x, _F32_MIN)
        xr = x.reshape(tr // _SUBLANE, _SUBLANE, _LANE)     # layout-free sublane grouping

        m_prev = m_ref[...].reshape(_SUBLANE, _LANE)
        l_prev = l_ref[...].reshape(_SUBLANE, _LANE)
        m_new = jnp.maximum(m_prev, jnp.max(xr, axis=0))
        p = jnp.exp(xr - m_new[None, :, :])
        l_new = l_prev * jnp.exp(m_prev - m_new) + jnp.sum(p, axis=0)
        m_ref[...] = m_new.reshape(m_ref.shape)
        l_ref[...] = l_new.reshape(l_ref.shape)

    part_shape = jax.ShapeDtypeStruct((b, n_splits, _SUBLANE, _LANE), jnp.float32)
    part_spec = pl.BlockSpec((1, 1, _SUBLANE, _LANE), lambda bi, si, ci: (bi, si, 0, 0))
    m_part, l_part = pl.pallas_call(
        stats_kernel,
        out_shape=[part_shape, part_shape],
        grid=(b, n_splits, cpt),
        in_specs=[pl.BlockSpec(
            (1, tr, _LANE),
            lambda bi, si, ci: (bi, jnp.minimum(si * cpt + ci, chunks - 1), 0))],
        out_specs=[part_spec, part_spec],
        compiler_params=pltpu.CompilerParams(
            dimension_semantics=("parallel", "parallel", "arbitrary"),
            vmem_limit_bytes=vmem_limit),
        cost_estimate=pl.CostEstimate(
            flops=5 * b * r_rows * _LANE, transcendentals=b * r_rows * _LANE,
            bytes_accessed=b * r_rows * _LANE * isz),
    )(x3)

    # ---- tiny combine in plain JAX (b x n_splits x 8 x 128 values) ------------
    m_max = jnp.max(m_part, axis=(1, 2, 3), keepdims=True)              # (b,1,1,1)
    total = jnp.sum(l_part * jnp.exp(m_part - m_max), axis=(1, 2, 3))   # (b,)
    lz = (jnp.log(total) + m_max.reshape(b)).astype(jnp.float32)
    lz2 = lz.reshape(b, 1)

    # ---- write-out phase: elementwise x - lz on the ORIGINAL (unpadded) input -
    tbb = b if b <= pack else pack
    cn = max(_LANE, (block_target // (tbb * isz)) // _LANE * _LANE)
    cn = min(cn, _round_up(n, _LANE))

    def writeout_kernel(x_ref, lz_ref, o_ref):
        o_ref[...] = (x_ref[...].astype(jnp.float32) - lz_ref[...]).astype(o_ref.dtype)

    return pl.pallas_call(
        writeout_kernel,
        out_shape=jax.ShapeDtypeStruct((b, n), out_dtype),
        grid=(_cdiv(b, tbb), _cdiv(n, cn)),
        in_specs=[pl.BlockSpec((tbb, cn), lambda gi, ci: (gi, ci)),
                  pl.BlockSpec((tbb, 1), lambda gi, ci: (gi, 0))],
        out_specs=pl.BlockSpec((tbb, cn), lambda gi, ci: (gi, ci)),
        compiler_params=pltpu.CompilerParams(
            dimension_semantics=("parallel", "parallel"),
            vmem_limit_bytes=vmem_limit),
        cost_estimate=pl.CostEstimate(
            flops=b * n, transcendentals=0,
            bytes_accessed=2 * b * n * isz),
    )(x2, lz2)


# ---------------------------------------------------------------------------
# Public wrapper (matches the PyTorch module's forward).
# ---------------------------------------------------------------------------
def heat_log_softmax(x, *, force_online=False):
    """x: [B, C, D, H, W] or [C, D, H, W]; log-softmax over all non-batch dims."""
    no_batch = x.ndim == 4
    if no_batch:
        x = x[None]
    b = x.shape[0]
    n = int(x.shape[1]) * int(x.shape[2]) * int(x.shape[3]) * int(x.shape[4])
    out_dtype = x.dtype
    isz = jnp.dtype(x.dtype).itemsize
    pack = _sublane_pack(x.dtype)
    vmem_limit, block_target = _tpu_budgets()

    x2 = x.reshape(b, n)

    # Path A iff the smallest legal batch tile (full rows resident) plus its
    # f32/exp temporaries fits the per-generation VMEM budget.
    min_tb = b if b <= pack else pack
    per_row = _round_up(n, _LANE) * (4 * isz + 16)
    path_a_ok = (min_tb * per_row) <= vmem_limit

    if path_a_ok and not force_online:
        out2 = _heat_lse_rows(x2, out_dtype, vmem_limit, block_target, pack)
    else:
        out2 = _heat_lse_online(x2, out_dtype, vmem_limit, block_target, pack)

    out = out2.reshape(x.shape)
    if no_batch:
        out = out[0]
    return out


if __name__ == "__main__":
    key = jax.random.PRNGKey(0)
    k1, k2, k3 = jax.random.split(key, 3)

    def reference(x):
        no_batch = x.ndim == 4
        xb = x[None] if no_batch else x
        xf = xb.reshape(xb.shape[0], -1)
        m = jnp.max(xf, axis=-1, keepdims=True)
        lz = jnp.log(jnp.sum(jnp.exp(xf - m), axis=-1, keepdims=True)) + m
        out = (xf - lz).reshape(xb.shape)
        return out[0] if no_batch else out

    # 1) batched, lane-aligned voxel count -> row-resident Path A
    x1 = jax.random.normal(k1, (2, 4, 8, 8, 8), dtype=jnp.float32)
    y1 = heat_log_softmax(x1)
    jax.block_until_ready(y1)
    assert y1.shape == x1.shape and y1.dtype == x1.dtype
    assert jnp.allclose(y1, reference(x1), atol=1e-4), "path A mismatch"

    # 2) no-batch input forced through the two-call online-LSE Path B
    x2 = jax.random.normal(k2, (4, 8, 8, 8), dtype=jnp.float32)
    y2 = heat_log_softmax(x2, force_online=True)
    jax.block_until_ready(y2)
    assert y2.shape == x2.shape and y2.dtype == x2.dtype
    assert jnp.allclose(y2, reference(x2), atol=1e-4), "path B mismatch"

    # 3) non-128-multiple voxel count (ragged minor dim), both paths
    x3 = jax.random.normal(k3, (2, 3, 5, 6, 7), dtype=jnp.float32)
    y3a = heat_log_softmax(x3)
    y3b = heat_log_softmax(x3, force_online=True)
    jax.block_until_ready((y3a, y3b))
    assert jnp.allclose(y3a, reference(x3), atol=1e-4), "path A (ragged) mismatch"
    assert jnp.allclose(y3b, reference(x3), atol=1e-4), "path B (ragged) mismatch"

    print("KERNEL_OK")
</pallas_src>

<mosaic_0001>
module attributes {stable_mosaic.version = 11 : i64} {
  func.func @_row_lse_kernel(%arg0: i32, %arg1: memref<2x2048xf32, #tpu.memory_space<vmem>>, %arg2: memref<2x2048xf32, #tpu.memory_space<vmem>>) attributes {dimension_semantics = [#tpu.dimension_semantics<parallel>], iteration_bounds = array<i64: 1>, scalar_prefetch = 0 : i64, scratch_operands = 0 : i64, tpu.core_type = #tpu.core_type<tc>, window_params = [{transform_indices = @transform_0, window_bounds = array<i64: 2, 2048>}, {transform_indices = @transform_1, window_bounds = array<i64: 2, 2048>}]} {
    %c0 = arith.constant 0 : index
    %c0_0 = arith.constant 0 : index
    %0 = vector.load %arg1[%c0, %c0_0] : memref<2x2048xf32, #tpu.memory_space<vmem>>, vector<2x2048xf32>
    %cst = arith.constant dense<0xFF800000> : vector<2xf32>
    %1 = vector.multi_reduction <maximumf>, %0, %cst [1] : vector<2x2048xf32> to vector<2xf32>
    %2 = vector.shape_cast %1 : vector<2xf32> to vector<2x1xf32>
    %3 = vector.broadcast %2 : vector<2x1xf32> to vector<2x2048xf32>
    %4 = arith.subf %0, %3 : vector<2x2048xf32>
    %5 = math.exp %4 : vector<2x2048xf32>
    %cst_1 = arith.constant dense<0.000000e+00> : vector<2xf32>
    %6 = vector.multi_reduction <add>, %5, %cst_1 [1] : vector<2x2048xf32> to vector<2xf32>
    %7 = vector.shape_cast %6 : vector<2xf32> to vector<2x1xf32>
    %8 = math.log %7 : vector<2x1xf32>
    %9 = arith.addf %8, %2 : vector<2x1xf32>
    %10 = vector.broadcast %9 : vector<2x1xf32> to vector<2x2048xf32>
    %11 = arith.subf %0, %10 : vector<2x2048xf32>
    %c0_2 = arith.constant 0 : index
    %c0_3 = arith.constant 0 : index
    %12 = vector.load %arg2[%c0_2, %c0_3] : memref<2x2048xf32, #tpu.memory_space<vmem>>, vector<2x2048xf32>
    tpu.vector_store %arg2[%c0_2, %c0_3], %11 {strides = array<i32>} : memref<2x2048xf32, #tpu.memory_space<vmem>>, vector<2x2048xf32>,
    return
  }
  func.func @transform_0(%arg0: i32) -> (i32, i32) {
    %c0_i32 = arith.constant 0 : i32
    %c0_i32_0 = arith.constant 0 : i32
    return %arg0, %c0_i32 : i32, i32
  }
  func.func @transform_1(%arg0: i32) -> (i32, i32) {
    %c0_i32 = arith.constant 0 : i32
    %c0_i32_0 = arith.constant 0 : i32
    return %arg0, %c0_i32 : i32, i32
  }
}

</mosaic_0001>

<bundles_post_ra>
// kernel: tpu_custom_call.1
= control target key start
LH: loop header
LB: loop body
LE: loop exit
PB: predicated region body
PF: predicated region fallthrough
CT: control target
= control target key end

     0   :  { %6 = vsyncpa [#allocation3], 0  ;;  %s496_s0 = inlined_call_operand.hbm [shape: f32[2,2048], index: 0, kind: input, shape index: {}]   ;;  %s497_s1 = inlined_call_operand.hbm [shape: f32[2,2048], index: 1, kind: output, shape index: {}]  }
   0x1   :  { %7 = vsyncpa [#allocation4], 0  ;;  %s386_s6 = smov [#allocation2]  }
   0x2   :  { %s14_s7 = sshll.u32 %s386_s6, 4  ;;  %s15_s7 = int_to_ptr.vmem [resolvable:$true] %s14_s7 }
   0x3   :  { %s350_s8 = scalar_lea.vmem %s15_s7, 512  ;;  %p355_p1 = scmp.lt.s32.totalorder %s15_s7, %s15_s7 }
   0x4   :  { %p351_p0 = scmp.ne.s32.totalorder %s15_s7, %s350_s8  ;;  %p356_p2 = scmp.lt.s32.totalorder %s350_s8, %s350_s8 }
   0x6   :  { %p357_p3 = por %p356_p2, %p355_p1 }
   0x8   :  { %p358_p4 = pnand %p357_p3, %p351_p0 }
   0xa   :  { %361 = shalt.err (!%p358_p4)
}
   0xb   :  { %17 = dma.hbm_to_vmem [thread:$0]  %s496_s0, 512, %s15_s7, [#allocation3]  }
   0xc   :  { %382 = dma.done.wait [#allocation3], 512  }
   0xd   :  { %383 = vsyncadd [#allocation3], 4294966784  ;;  %v33_v0 = vlaneseq  ;;  %v387_v1 = vmov 1983009808   ;;  %v408_v6 = vld [vmem:[#allocation2] sm:$0xff]  ;;  %v410_v7 = vld [vmem:[#allocation2 + $0x8] sm:$0xff] }
   0xe   :  { %v31_v2 = vunpack.c.l.s4 %v387_v1  ;;  %v412_v8 = vld [vmem:[#allocation2 + $0x10] sm:$0xff]  ;;  %vm113_vm0 = vcmask 1041408   ;;  %v414_v9 = vld [vmem:[#allocation2 + $0x18] sm:$0xff]  ;;  %v29_v10 = vcombine.high %v408_v6, %v408_v6  ;;  %v46_v12 = vcombine.high %v410_v7, %v410_v7  ;;  %s389_s0 = smov [#allocation5]  }
   0xf   :  { %v403_v3 = vshrl.u32 %v33_v0, 7  ;;  %v63_v14 = vcombine.high %v412_v8, %v412_v8  ;;  %v80_v16 = vcombine.high %v414_v9, %v414_v9  ;;  %v388_v61 = vmov 269488144   ;;  %s315_s11 = sshll.u32 %s389_s0, 4  ;;  %s316_s11 = int_to_ptr.vmem [resolvable:$true] %s315_s11 }
  0x10   :  { %v32_v4 = vunpack.c.0.s8 %v31_v2  ;;  %v149_v62 = vunpack.c.l.s4 %v388_v61  ;;  %s362_s12 = scalar_lea.vmem %s316_s11, 512  ;;  %p367_p6 = scmp.lt.s32.totalorder %s316_s11, %s316_s11 }
  0x11   :  { %p363_p5 = scmp.ne.s32.totalorder %s316_s11, %s362_s12  ;;  %p368_p7 = scmp.lt.s32.totalorder %s362_s12, %s362_s12 }
  0x12   :  { %v406_v5 = vsub.s32 %v32_v4, %v403_v3  ;;  %v150_v63 = vunpack.c.0.s8 %v149_v62 }
  0x13   :  { %p369_p8 = por %p368_p7, %p367_p6 }
  0x14   :  { %v36_v11 = vrot.slane %v408_v6, %v406_v5  ;;  %v53_v13 = vrot.slane %v410_v7, %v406_v5  ;;  %v70_v15 = vrot.slane %v412_v8, %v406_v5  ;;  %v87_v17 = vrot.slane %v414_v9, %v406_v5 }
  0x15   :  { %v43_v18 = vrot.slane %v29_v10, %v406_v5  ;;  %v60_v20 = vrot.slane %v46_v12, %v406_v5  ;;  %v77_v22 = vrot.slane %v63_v14, %v406_v5  ;;  %v94_v24 = vrot.slane %v80_v16, %v406_v5  ;;  %p370_p9 = pnand %p369_p8, %p363_p5 }
  0x16   :  { %v44_v19 = vcombine.high %v36_v11, %v36_v11  ;;  %v61_v21 = vcombine.high %v53_v13, %v53_v13  ;;  %v78_v23 = vcombine.high %v70_v15, %v70_v15  ;;  %v95_v25 = vcombine.high %v87_v17, %v87_v17 }
  0x17   :  { %v45_v26 = vcombine.high %v43_v18, %v43_v18  ;;  %v62_v27 = vcombine.high %v60_v20, %v60_v20  ;;  %v114_v28 = vsel %vm113_vm0, %v36_v11, -inf  ;;  %v79_v30 = vcombine.high %v77_v22, %v77_v22 }
  0x18   :  { %v115_v29 = vsel %vm113_vm0, %v44_v19, -inf  ;;  %v96_v31 = vcombine.high %v94_v24, %v94_v24  ;;  %v116_v32 = vsel %vm113_vm0, %v43_v18, -inf  ;;  %v118_v33 = vsel %vm113_vm0, %v53_v13, -inf }
  0x19   :  { %v117_v34 = vsel %vm113_vm0, %v45_v26, -inf  ;;  %v119_v35 = vmax.f32 %v114_v28, %v118_v33  ;;  %v120_v36 = vsel %vm113_vm0, %v61_v21, -inf  ;;  %v122_v37 = vsel %vm113_vm0, %v60_v20, -inf }
  0x1a   :  { %v121_v38 = vmax.f32 %v115_v29, %v120_v36  ;;  %v123_v39 = vmax.f32 %v116_v32, %v122_v37  ;;  %v124_v40 = vsel %vm113_vm0, %v62_v27, -inf  ;;  %v126_v41 = vsel %vm113_vm0, %v70_v15, -inf }
  0x1b   :  { %v125_v42 = vmax.f32 %v117_v34, %v124_v40  ;;  %v127_v43 = vmax.f32 %v119_v35, %v126_v41  ;;  %v128_v44 = vsel %vm113_vm0, %v78_v23, -inf  ;;  %v130_v45 = vsel %vm113_vm0, %v77_v22, -inf }
  0x1c   :  { %v129_v46 = vmax.f32 %v121_v38, %v128_v44  ;;  %v131_v47 = vmax.f32 %v123_v39, %v130_v45  ;;  %v132_v48 = vsel %vm113_vm0, %v79_v30, -inf  ;;  %v134_v49 = vsel %vm113_vm0, %v87_v17, -inf }
  0x1d   :  { %v133_v50 = vmax.f32 %v125_v42, %v132_v48  ;;  %v135_v51 = vmax.f32 %v127_v43, %v134_v49  ;;  %v136_v52 = vsel %vm113_vm0, %v95_v25, -inf  ;;  %v138_v53 = vsel %vm113_vm0, %v94_v24, -inf }
  0x1e   :  { %v137_v54 = vmax.f32 %v129_v46, %v136_v52  ;;  %v139_v55 = vmax.f32 %v131_v47, %v138_v53  ;;  %v140_v56 = vsel %vm113_vm0, %v96_v31, -inf  ;;  %v453_v0 = vsub.s32 %v150_v63, %v403_v3 }
  0x1f   :  { %v141_v57 = vmax.f32 %v133_v50, %v140_v56 }
  0x20   :  { %v142_v58 = vmax.f32 %v135_v51, %v137_v54 }
  0x21   :  { %v143_v59 = vmax.f32 %v139_v55, %v141_v57 }
  0x23   :  { %v144_v60 = vmax.f32 %v142_v58, %v143_v59 }
  0x25   :  { %145 = vmax.xlane.f32.xlu0 %v144_v60 }
  0xae   :  { %v455_v1 = vpop.xlane.xlu0 %145 }
  0xaf   :  { %v154_v2 = vrot.slane %v455_v1, %v453_v0 }
  0xb1   :  { %v156_v4 = vsub.f32 %v408_v6, %v154_v2  ;;  %v157_v10 = vsub.f32 %v410_v7, %v154_v2  ;;  %v158_v13 = vsub.f32 %v412_v8, %v154_v2  ;;  %v159_v15 = vsub.f32 %v414_v9, %v154_v2 }
  0xb3   :  { %v160_v11 = vmul.f32 1.442695, %v156_v4  ;;  %v162_v12 = vmul.f32 1.442695, %v157_v10  ;;  %v164_v14 = vmul.f32 1.442695, %v158_v13 }
  0xb4   :  { %v166_v16 = vmul.f32 1.442695, %v159_v15 }
  0xb5   :  { %332 = vpow2.f32 %v160_v11 }
  0xb6   :  { %334 = vpow2.f32 %v162_v12 }
  0xb7   :  { %336 = vpow2.f32 %v164_v14 }
  0xb8   :  { %338 = vpow2.f32 %v166_v16 }
  0xc2   :  { %v333_v3 = vpop.eup %332 }
  0xc3   :  { %v335_v17 = vpop.eup %334  ;;  %v172_v18 = vcombine.high %v333_v3, %v333_v3  ;;  %v179_v19 = vrot.slane %v333_v3, %v406_v5 }
  0xc4   :  { %v196_v22 = vrot.slane %v335_v17, %v406_v5  ;;  %v189_v26 = vcombine.high %v335_v17, %v335_v17  ;;  %v337_v33 = vpop.eup %336 }
  0xc5   :  { %v186_v20 = vrot.slane %v172_v18, %v406_v5  ;;  %v187_v21 = vcombine.high %v179_v19, %v179_v19  ;;  %v256_v23 = vsel %vm113_vm0, %v179_v19, 0.0  ;;  %v206_v38 = vcombine.high %v337_v33, %v337_v33  ;;  %v339_v44 = vpop.eup %338 }
  0xc6   :  { %v203_v30 = vrot.slane %v189_v26, %v406_v5  ;;  %v204_v31 = vcombine.high %v196_v22, %v196_v22  ;;  %v263_v35 = vsel %vm113_vm0, %v196_v22, 0.0  ;;  %v213_v39 = vrot.slane %v337_v33, %v406_v5 }
  0xc7   :  { %v257_v24 = vsel %vm113_vm0, %v187_v21, 0.0  ;;  %v188_v25 = vcombine.high %v186_v20, %v186_v20  ;;  %v259_v28 = vsel %vm113_vm0, %v186_v20, 0.0  ;;  %v220_v45 = vrot.slane %v206_v38, %v406_v5 }
  0xc8   :  { %v258_v27 = vadd.f32 %v257_v24, %v256_v23  ;;  %v205_v37 = vcombine.high %v203_v30, %v203_v30  ;;  %v265_v40 = vsel %vm113_vm0, %v204_v31, 0.0  ;;  %v267_v42 = vsel %vm113_vm0, %v203_v30, 0.0 }
  0xc9   :  { %v261_v32 = vsel %vm113_vm0, %v188_v25, 0.0  ;;  %v221_v46 = vcombine.high %v213_v39, %v213_v39  ;;  %v271_v49 = vsel %vm113_vm0, %v213_v39, 0.0  ;;  %v222_v51 = vcombine.high %v220_v45, %v220_v45 }
  0xca   :  { %v260_v29 = vadd.f32 %v259_v28, %v258_v27  ;;  %v269_v47 = vsel %vm113_vm0, %v205_v37, 0.0  ;;  %v223_v52 = vcombine.high %v339_v44, %v339_v44  ;;  %v230_v53 = vrot.slane %v339_v44, %v406_v5 }
  0xcb   :  { %v273_v54 = vsel %vm113_vm0, %v221_v46, 0.0  ;;  %v275_v56 = vsel %vm113_vm0, %v220_v45, 0.0  ;;  %v277_v60 = vsel %vm113_vm0, %v222_v51, 0.0 }
  0xcc   :  { %v262_v34 = vadd.f32 %v261_v32, %v260_v29  ;;  %v237_v58 = vrot.slane %v223_v52, %v406_v5  ;;  %v238_v59 = vcombine.high %v230_v53, %v230_v53  ;;  %v279_v62 = vsel %vm113_vm0, %v230_v53, 0.0 }
  0xce   :  { %v264_v36 = vadd.f32 %v263_v35, %v262_v34  ;;  %v239_v2 = vcombine.high %v237_v58, %v237_v58  ;;  %v281_v4 = vsel %vm113_vm0, %v238_v59, 0.0  ;;  %v283_v11 = vsel %vm113_vm0, %v237_v58, 0.0 }
  0xd0   :  { %v266_v41 = vadd.f32 %v265_v40, %v264_v36  ;;  %v285_v13 = vsel %vm113_vm0, %v239_v2, 0.0 }
  0xd2   :  { %v268_v43 = vadd.f32 %v267_v42, %v266_v41 }
  0xd4   :  { %v270_v48 = vadd.f32 %v269_v47, %v268_v43 }
  0xd6   :  { %v272_v50 = vadd.f32 %v271_v49, %v270_v48 }
  0xd8   :  { %v274_v55 = vadd.f32 %v273_v54, %v272_v50 }
  0xda   :  { %v276_v57 = vadd.f32 %v275_v56, %v274_v55 }
  0xdc   :  { %v278_v61 = vadd.f32 %v277_v60, %v276_v57 }
  0xde   :  { %v280_v63 = vadd.f32 %v279_v62, %v278_v61 }
  0xe0   :  { %v282_v10 = vadd.f32 %v281_v4, %v280_v63 }
  0xe2   :  { %v284_v12 = vadd.f32 %v283_v11, %v282_v10 }
  0xe4   :  { %v286_v14 = vadd.f32 %v285_v13, %v284_v12 }
  0xe6   :  { %287 = vadd.xlane.f32.xlu0 %v286_v14 }
 0x16f   :  { %v288_v15 = vpop.xlane.xlu0 %287 }
 0x170   :  { %340 = vlog2.f32 %v288_v15 }
 0x17d   :  { %v341_v5 = vpop.eup %340 }
 0x17e   :  { %v290_v3 = vmul.f32 0.6931472, %v341_v5 }
 0x180   :  { %v291_v16 = vadd.f32 %v290_v3, %v455_v1 }
 0x182   :  { %v299_v17 = vrot.slane %v291_v16, %v453_v0 }
 0x184   :  { %v301_v18 = vsub.f32 %v408_v6, %v299_v17  ;;  %v302_v19 = vsub.f32 %v410_v7, %v299_v17  ;;  %v303_v20 = vsub.f32 %v412_v8, %v299_v17  ;;  %v304_v21 = vsub.f32 %v414_v9, %v299_v17 }
 0x186   :  { %305 = vst [vmem:[#allocation5] sm:$0xff] %v301_v18  ;;  %306 = vst [vmem:[#allocation5 + $0x8] sm:$0xff] %v302_v19 }
 0x187   :  { %307 = vst [vmem:[#allocation5 + $0x10] sm:$0xff] %v303_v20  ;;  %308 = vst [vmem:[#allocation5 + $0x18] sm:$0xff] %v304_v21 }
 0x188   :  { %373 = shalt.err (!%p370_p9)
}
 0x189   :  { %318 = dma.vmem_to_hbm [thread:$0]  %s316_s11, 512, %s497_s1, [#allocation4]  }
 0x18a   :  { %384 = dma.done.wait [#allocation4], 512  }
 0x18b   :  { %385 = vsyncadd [#allocation4], 4294966784 }
 0x18c   :  { %322 = vsyncpa [#allocation3], 1 }
 0x18d   :  { %323 = vsyncpa [#allocation4], 1 }

</bundles_post_ra>
